<compile_context>
chip_gen: v7x
topology: tpu7x:2x2x1
jax: 0.10.0
libtpu: 0.0.40
codegen_flags: <defaults>
</compile_context>

<pallas_src>
import jax
import jax.numpy as jnp
from jax import lax
from jax.experimental import pallas as pl
from jax.experimental.pallas import tpu as pltpu


def _round_up(x, m):
    return ((x + m - 1) // m) * m


def _fused_inversion_kernel(x_ref, w_ref, o_ref):
    # x_ref: (S_blk, M*N)   w_ref: (M*N, P*Q)   o_ref: (S_blk, P*Q)
    y = jnp.dot(x_ref[...], w_ref[...], preferred_element_type=jnp.float32)
    # leaky_relu with PyTorch default negative_slope = 0.01
    o_ref[...] = jnp.maximum(y, 0.01 * y).astype(o_ref.dtype)


def initial_inversion2(meas, WL, WR):
    """meas: (B, C, M, N); WL: (M, P, K); WR: (N, Q, K). Returns (B, C, P, Q)."""
    B, C, M, N = meas.shape
    P = WL.shape[1]
    Q = WR.shape[1]
    MN = M * N
    PQ = P * Q

    # (M*N, P*Q) operator with Wop[m*N + n, p*Q + q] = WL0[m, p] * WR0[n, q],
    # exactly matching row-major flattening of meas[b, c] and of the output.
    wl0 = WL[:, :, 0]  # (M, P)
    wr0 = WR[:, :, 0]  # (N, Q)
    wop = jnp.kron(wl0, wr0).astype(meas.dtype)  # (M*N, P*Q)

    # Batch all (b, c) slices along one axis and tile it (multiples of 8 rows).
    S = B * C
    S_blk = min(256, _round_up(S, 8))
    S_pad = _round_up(S, S_blk)
    x_flat = meas.reshape(S, MN)
    if S_pad != S:
        x_flat = jnp.pad(x_flat, ((0, S_pad - S), (0, 0)))

    grid = (S_pad // S_blk,)
    out_flat = pl.pallas_call(
        _fused_inversion_kernel,
        out_shape=jax.ShapeDtypeStruct((S_pad, PQ), meas.dtype),
        grid_spec=pltpu.PrefetchScalarGridSpec(
            num_scalar_prefetch=0,
            grid=grid,
            in_specs=[
                pl.BlockSpec((S_blk, MN), lambda i: (i, 0)),
                pl.BlockSpec((MN, PQ), lambda i: (0, 0)),  # grid-invariant weights
            ],
            out_specs=pl.BlockSpec((S_blk, PQ), lambda i: (i, 0)),
        ),
        compiler_params=pltpu.CompilerParams(
            dimension_semantics=("parallel",),
        ),
    )(x_flat, wop)

    return out_flat[:S].reshape(B, C, P, Q)


def _reference(meas, WL, WR):
    wl0 = WL[:, :, 0]
    wr0 = WR[:, :, 0]
    # (B, C, P, Q) = WL0^T @ meas @ WR0 per (b, c), then leaky_relu.
    y = jnp.einsum(
        "mp,bcmn,nq->bcpq", wl0, meas, wr0, precision=lax.Precision.HIGHEST
    )
    return jnp.where(y >= 0.0, y, 0.01 * y)


if __name__ == "__main__":
    B, C, M, N = 2, 3, 16, 16
    P, Q, K = 32, 32, 2

    key = jax.random.PRNGKey(0)
    k1, k2, k3 = jax.random.split(key, 3)
    meas = jax.random.normal(k1, (B, C, M, N), dtype=jnp.float32)
    WL = jax.random.normal(k2, (M, P, K), dtype=jnp.float32) * 0.1
    WR = jax.random.normal(k3, (N, Q, K), dtype=jnp.float32) * 0.1

    out = initial_inversion2(meas, WL, WR)
    out = jax.block_until_ready(out)

    ref = _reference(meas, WL, WR)
    assert out.shape == (B, C, P, Q), out.shape
    max_err = jnp.max(jnp.abs(out - ref))
    assert jnp.allclose(out, ref, atol=1e-3, rtol=1e-3), (
        f"mismatch vs reference, max abs err={max_err}"
    )

    print("KERNEL_OK")
</pallas_src>

<mosaic_0001>
module attributes {stable_mosaic.version = 11 : i64} {
  func.func @_fused_inversion_kernel(%arg0: i32, %arg1: memref<8x256xf32, #tpu.memory_space<vmem>>, %arg2: memref<256x1024xf32, #tpu.memory_space<vmem>>, %arg3: memref<8x1024xf32, #tpu.memory_space<vmem>>) attributes {dimension_semantics = [#tpu.dimension_semantics<parallel>], iteration_bounds = array<i64: 1>, scalar_prefetch = 0 : i64, scratch_operands = 0 : i64, tpu.core_type = #tpu.core_type<tc>, window_params = [{transform_indices = @transform_0, window_bounds = array<i64: 8, 256>}, {pipeline_mode = #tpu.pipeline_mode<synchronous>, transform_indices = @transform_1, window_bounds = array<i64: 256, 1024>}, {transform_indices = @transform_2, window_bounds = array<i64: 8, 1024>}]} {
    %c0 = arith.constant 0 : index
    %c0_0 = arith.constant 0 : index
    %0 = vector.load %arg1[%c0, %c0_0] : memref<8x256xf32, #tpu.memory_space<vmem>>, vector<8x256xf32>
    %c0_1 = arith.constant 0 : index
    %c0_2 = arith.constant 0 : index
    %1 = vector.load %arg2[%c0_1, %c0_2] : memref<256x1024xf32, #tpu.memory_space<vmem>>, vector<256x1024xf32>
    %cst = arith.constant dense<0.000000e+00> : vector<8x1024xf32>
    %2 = tpu.matmul %0, %1, %cst {dimension_numbers = #tpu.dot_dimension_numbers<[1], [0], [0], [1], [0, 0, 1, 1], [], []>} : vector<8x256xf32>, vector<256x1024xf32>, vector<8x1024xf32> -> vector<8x1024xf32>
    %cst_3 = arith.constant 0.00999999977 : f32
    %3 = vector.broadcast %cst_3 : f32 to vector<8x1024xf32>
    %4 = arith.mulf %3, %2 : vector<8x1024xf32>
    %5 = arith.maximumf %2, %4 : vector<8x1024xf32>
    %c0_4 = arith.constant 0 : index
    %c0_5 = arith.constant 0 : index
    %6 = vector.load %arg3[%c0_4, %c0_5] : memref<8x1024xf32, #tpu.memory_space<vmem>>, vector<8x1024xf32>
    tpu.vector_store %arg3[%c0_4, %c0_5], %5 {strides = array<i32>} : memref<8x1024xf32, #tpu.memory_space<vmem>>, vector<8x1024xf32>,
    return
  }
  func.func @transform_0(%arg0: i32) -> (i32, i32) {
    %c0_i32 = arith.constant 0 : i32
    %c0_i32_0 = arith.constant 0 : i32
    return %arg0, %c0_i32 : i32, i32
  }
  func.func @transform_1(%arg0: i32) -> (i32, i32) {
    %c0_i32 = arith.constant 0 : i32
    %c0_i32_0 = arith.constant 0 : i32
    %c0_i32_1 = arith.constant 0 : i32
    return %c0_i32, %c0_i32_0 : i32, i32
  }
  func.func @transform_2(%arg0: i32) -> (i32, i32) {
    %c0_i32 = arith.constant 0 : i32
    %c0_i32_0 = arith.constant 0 : i32
    return %arg0, %c0_i32 : i32, i32
  }
}

</mosaic_0001>

<bundles_post_ra>
// kernel: tpu_custom_call.1
= control target key start
LH: loop header
LB: loop body
LE: loop exit
PB: predicated region body
PF: predicated region fallthrough
CT: control target
= control target key end

     0   :  { %7 = vsyncpa [#allocation3], 0  ;;  %s1028_s0 = inlined_call_operand.hbm [shape: f32[8,256], index: 0, kind: input, shape index: {}]   ;;  %s1029_s1 = inlined_call_operand.hbm [shape: f32[256,1024], index: 1, kind: input, shape index: {}]   ;;  %s1030_s2 = inlined_call_operand.hbm [shape: f32[8,1024], index: 2, kind: output, shape index: {}]  }
   0x1   :  { %8 = vsyncpa [#allocation6], 0 }
   0x2   :  { %9 = vsyncpa [#allocation4], 0  ;;  %s953_s9 = smov [#allocation2]   ;;  %s954_s11 = smov [#allocation5]  }
   0x3   :  { %s16_s10 = sshll.u32 %s953_s9, 4  ;;  %s25_s12 = sshll.u32 %s954_s11, 4  ;;  %s17_s10 = int_to_ptr.vmem [resolvable:$true] %s16_s10  ;;  %s973_s12 = int_to_ptr.vmem [resolvable:$true] %s25_s12 }
   0x4   :  { %s881_s15 = scalar_lea.hbm %s1028_s0, 256 }
   0x5   :  { %p882_p0 = scmp.ne.s32.totalorder %s1028_s0, %s881_s15  ;;  %p885_p1 = scmp.lt.u32.totalorder %s881_s15, %s1028_s0 }
   0x7   :  { %p887_p2 = pnand %p885_p1, %p882_p0 }
   0x9   :  { %890 = shalt.err (!%p887_p2)
}
   0xa   :  { %s891_s20 = scalar_lea.vmem %s17_s10, 256  ;;  %p896_p4 = scmp.lt.s32.totalorder %s17_s10, %s17_s10 }
   0xb   :  { %p892_p3 = scmp.ne.s32.totalorder %s17_s10, %s891_s20  ;;  %p897_p5 = scmp.lt.s32.totalorder %s891_s20, %s891_s20 }
   0xd   :  { %p898_p6 = por %p897_p5, %p896_p4 }
   0xf   :  { %p899_p7 = pnand %p898_p6, %p892_p3 }
  0x11   :  { %902 = shalt.err (!%p899_p7)
}
  0x12   :  { %19 = dma.hbm_to_vmem [thread:$0]  %s1028_s0, 256, %s17_s10, [#allocation3]  }
  0x13   :  { %s903_s25 = scalar_lea.hbm %s1029_s1, 32768 }
  0x14   :  { %p904_p8 = scmp.ne.s32.totalorder %s1029_s1, %s903_s25  ;;  %p907_p9 = scmp.lt.u32.totalorder %s903_s25, %s1029_s1 }
  0x16   :  { %p909_p10 = pnand %p907_p9, %p904_p8 }
  0x18   :  { %912 = shalt.err (!%p909_p10)
}
  0x19   :  { %s913_s30 = scalar_lea.vmem %s973_s12, 32768  ;;  %p918_p12 = scmp.lt.s32.totalorder %s973_s12, %s973_s12 }
  0x1a   :  { %p914_p11 = scmp.ne.s32.totalorder %s973_s12, %s913_s30  ;;  %p919_p13 = scmp.lt.s32.totalorder %s913_s30, %s913_s30 }
  0x1c   :  { %p920_p0 = por %p919_p13, %p918_p12 }
  0x1e   :  { %p921_p1 = pnand %p920_p0, %p914_p11 }
  0x20   :  { %924 = shalt.err (!%p921_p1)
}
  0x21   :  { %s955_s0 = smov 1024   ;;  %s956_s3 = smov 64  }
  0x22   :  { %31 = dma.hbm_to_vmem [thread:$0]  %s1029_s1, 32768, %s973_s12, [#allocation6], %s955_s0, %s955_s0, %s956_s3  }
  0x23   :  { %947 = dma.done.wait [#allocation3], 256  }
  0x24   :  { %948 = vsyncadd [#allocation3], 4294967040 }
  0x25   :  { %949 = dma.done.wait [#allocation6], 32768  }
  0x26   :  { %950 = vsyncadd [#allocation6], 4294934528  ;;  %v41_v0 = vld [vmem:[#allocation5 + $0x8] sm:$0xff]  ;;  %v43_v2 = vld [vmem:[#allocation5 + $0x18] sm:$0xff]  ;;  %s957_s1 = smov [#allocation7]  }
  0x27   :  { %v49_v1 = vld [vmem:[#allocation5 + $0x48] sm:$0xff]  ;;  %v51_v4 = vld [vmem:[#allocation5 + $0x58] sm:$0xff]  ;;  %v40_v5 = vld [vmem:[#allocation5] sm:$0xff]  ;;  %s610_s6 = sshll.u32 %s957_s1, 4  ;;  %s611_s6 = int_to_ptr.vmem [resolvable:$true] %s610_s6 }
  0x28   :  { %v620_v3 = vpack.c.bf16 %v49_v1, %v41_v0  ;;  %v48_v6 = vld [vmem:[#allocation5 + $0x40] sm:$0xff]  ;;  %v684_v7 = vpack.c.bf16 %v51_v4, %v43_v2  ;;  %v42_v9 = vld [vmem:[#allocation5 + $0x10] sm:$0xff]  ;;  %v57_v11 = vld [vmem:[#allocation5 + $0x88] sm:$0xff]  ;;  %s925_s7 = scalar_lea.vmem %s611_s6, 1024  ;;  %p930_p3 = scmp.lt.s32.totalorder %s611_s6, %s611_s6 }
  0x29   :  { %v622_v8 = vpack.c.bf16 %v48_v6, %v40_v5  ;;  %v50_v10 = vld [vmem:[#allocation5 + $0x50] sm:$0xff]  ;;  %v65_v13 = vld [vmem:[#allocation5 + $0xc8] sm:$0xff]  ;;  %v59_v14 = vld [vmem:[#allocation5 + $0x98] sm:$0xff]  ;;  %p926_p2 = scmp.ne.s32.totalorder %s611_s6, %s925_s7  ;;  %p931_p4 = scmp.lt.s32.totalorder %s925_s7, %s925_s7 }
  0x2a   :  { %621 = vmatprep.subr.bf16.mxu0 %v620_v3  ;;  %v686_v12 = vpack.c.bf16 %v50_v10, %v42_v9  ;;  %v67_v15 = vld [vmem:[#allocation5 + $0xd8] sm:$0xff]  ;;  %685 = vmatprep.subr.bf16.mxu1 %v684_v7  ;;  %v624_v16 = vpack.c.bf16 %v65_v13, %v57_v11  ;;  %v56_v18 = vld [vmem:[#allocation5 + $0x80] sm:$0xff]  ;;  %v58_v20 = vld [vmem:[#allocation5 + $0x90] sm:$0xff] }
  0x2b   :  { %623 = vmatpush1.bf16.msra.mxu0 %v622_v8  ;;  %v688_v17 = vpack.c.bf16 %v67_v15, %v59_v14  ;;  %v64_v19 = vld [vmem:[#allocation5 + $0xc0] sm:$0xff]  ;;  %v66_v22 = vld [vmem:[#allocation5 + $0xd0] sm:$0xff]  ;;  %v73_v23 = vld [vmem:[#allocation5 + $0x108] sm:$0xff]  ;;  %p932_p5 = por %p931_p4, %p930_p3 }
  0x2c   :  { %687 = vmatpush1.bf16.msra.mxu1 %v686_v12  ;;  %v626_v21 = vpack.c.bf16 %v64_v19, %v56_v18  ;;  %v81_v24 = vld [vmem:[#allocation5 + $0x148] sm:$0xff]  ;;  %625 = vmatprep.subr.bf16.mxu0 %v624_v16  ;;  %v690_v25 = vpack.c.bf16 %v66_v22, %v58_v20  ;;  %v75_v27 = vld [vmem:[#allocation5 + $0x118] sm:$0xff]  ;;  %v72_v29 = vld [vmem:[#allocation5 + $0x100] sm:$0xff] }
  0x2d   :  { %689 = vmatprep.subr.bf16.mxu1 %v688_v17  ;;  %v628_v26 = vpack.c.bf16 %v81_v24, %v73_v23  ;;  %v83_v28 = vld [vmem:[#allocation5 + $0x158] sm:$0xff]  ;;  %v80_v31 = vld [vmem:[#allocation5 + $0x140] sm:$0xff]  ;;  %v74_v32 = vld [vmem:[#allocation5 + $0x110] sm:$0xff]  ;;  %p933_p6 = pnand %p932_p5, %p926_p2 }
  0x2e   :  { %v692_v30 = vpack.c.bf16 %v83_v28, %v75_v27  ;;  %v82_v33 = vld [vmem:[#allocation5 + $0x150] sm:$0xff]  ;;  %v630_v34 = vpack.c.bf16 %v80_v31, %v72_v29  ;;  %v89_v35 = vld [vmem:[#allocation5 + $0x188] sm:$0xff]  ;;  %v91_v37 = vld [vmem:[#allocation5 + $0x198] sm:$0xff] }
  0x2f   :  { %627 = vmatpush1.bf16.msra.mxu0 %v626_v21  ;;  %v97_v36 = vld [vmem:[#allocation5 + $0x1c8] sm:$0xff]  ;;  %v694_v38 = vpack.c.bf16 %v82_v33, %v74_v32  ;;  %v99_v40 = vld [vmem:[#allocation5 + $0x1d8] sm:$0xff]  ;;  %v88_v41 = vld [vmem:[#allocation5 + $0x180] sm:$0xff] }
  0x30   :  { %691 = vmatpush1.bf16.msra.mxu1 %v690_v25  ;;  %629 = vmatprep.subr.bf16.mxu0 %v628_v26  ;;  %v632_v39 = vpack.c.bf16 %v97_v36, %v89_v35  ;;  %v96_v42 = vld [vmem:[#allocation5 + $0x1c0] sm:$0xff]  ;;  %v696_v43 = vpack.c.bf16 %v99_v40, %v91_v37  ;;  %v90_v44 = vld [vmem:[#allocation5 + $0x190] sm:$0xff]  ;;  %v105_v46 = vld [vmem:[#allocation5 + $0x208] sm:$0xff] }
  0x31   :  { %693 = vmatprep.subr.bf16.mxu1 %v692_v30  ;;  %v98_v45 = vld [vmem:[#allocation5 + $0x1d0] sm:$0xff]  ;;  %v113_v47 = vld [vmem:[#allocation5 + $0x248] sm:$0xff]  ;;  %v107_v48 = vld [vmem:[#allocation5 + $0x218] sm:$0xff]  ;;  %v634_v50 = vpack.c.bf16 %v96_v42, %v88_v41 }
  0x32   :  { %v115_v49 = vld [vmem:[#allocation5 + $0x258] sm:$0xff]  ;;  %v698_v51 = vpack.c.bf16 %v98_v45, %v90_v44  ;;  %v636_v52 = vpack.c.bf16 %v113_v47, %v105_v46  ;;  %v104_v53 = vld [vmem:[#allocation5 + $0x200] sm:$0xff]  ;;  %v106_v55 = vld [vmem:[#allocation5 + $0x210] sm:$0xff] }
  0x33   :  { %631 = vmatpush1.bf16.msra.mxu0 %v630_v34  ;;  %v112_v54 = vld [vmem:[#allocation5 + $0x240] sm:$0xff]  ;;  %v700_v56 = vpack.c.bf16 %v115_v49, %v107_v48  ;;  %v114_v57 = vld [vmem:[#allocation5 + $0x250] sm:$0xff]  ;;  %v121_v58 = vld [vmem:[#allocation5 + $0x288] sm:$0xff] }
  0x34   :  { %695 = vmatpush1.bf16.msra.mxu1 %v694_v38  ;;  %633 = vmatprep.subr.bf16.mxu0 %v632_v39  ;;  %v129_v59 = vld [vmem:[#allocation5 + $0x2c8] sm:$0xff]  ;;  %v123_v60 = vld [vmem:[#allocation5 + $0x298] sm:$0xff]  ;;  %v638_v62 = vpack.c.bf16 %v112_v54, %v104_v53  ;;  %v702_v63 = vpack.c.bf16 %v114_v57, %v106_v55  ;;  %v120_v1 = vld [vmem:[#allocation5 + $0x280] sm:$0xff] }
  0x35   :  { %697 = vmatprep.subr.bf16.mxu1 %v696_v43  ;;  %v131_v61 = vld [vmem:[#allocation5 + $0x2d8] sm:$0xff]  ;;  %v640_v0 = vpack.c.bf16 %v129_v59, %v121_v58  ;;  %v128_v2 = vld [vmem:[#allocation5 + $0x2c0] sm:$0xff]  ;;  %v122_v3 = vld [vmem:[#allocation5 + $0x290] sm:$0xff] }
  0x36   :  { %v704_v4 = vpack.c.bf16 %v131_v61, %v123_v60  ;;  %v130_v5 = vld [vmem:[#allocation5 + $0x2d0] sm:$0xff]  ;;  %v137_v6 = vld [vmem:[#allocation5 + $0x308] sm:$0xff]  ;;  %v139_v8 = vld [vmem:[#allocation5 + $0x318] sm:$0xff]  ;;  %v642_v10 = vpack.c.bf16 %v128_v2, %v120_v1 }
  0x37   :  { %635 = vmatpush1.bf16.msra.mxu0 %v634_v50  ;;  %v145_v7 = vld [vmem:[#allocation5 + $0x348] sm:$0xff]  ;;  %v147_v9 = vld [vmem:[#allocation5 + $0x358] sm:$0xff]  ;;  %v706_v11 = vpack.c.bf16 %v130_v5, %v122_v3  ;;  %v136_v13 = vld [vmem:[#allocation5 + $0x300] sm:$0xff] }
  0x38   :  { %699 = vmatpush1.bf16.msra.mxu1 %v698_v51  ;;  %637 = vmatprep.subr.bf16.mxu0 %v636_v52  ;;  %v644_v12 = vpack.c.bf16 %v145_v7, %v137_v6  ;;  %v144_v14 = vld [vmem:[#allocation5 + $0x340] sm:$0xff]  ;;  %v138_v15 = vld [vmem:[#allocation5 + $0x310] sm:$0xff]  ;;  %v708_v16 = vpack.c.bf16 %v147_v9, %v139_v8  ;;  %v153_v18 = vld [vmem:[#allocation5 + $0x388] sm:$0xff] }
  0x39   :  { %701 = vmatprep.subr.bf16.mxu1 %v700_v56  ;;  %v146_v17 = vld [vmem:[#allocation5 + $0x350] sm:$0xff]  ;;  %v161_v19 = vld [vmem:[#allocation5 + $0x3c8] sm:$0xff]  ;;  %v155_v20 = vld [vmem:[#allocation5 + $0x398] sm:$0xff]  ;;  %v646_v22 = vpack.c.bf16 %v144_v14, %v136_v13 }
  0x3a   :  { %v163_v21 = vld [vmem:[#allocation5 + $0x3d8] sm:$0xff]  ;;  %v710_v23 = vpack.c.bf16 %v146_v17, %v138_v15  ;;  %v648_v24 = vpack.c.bf16 %v161_v19, %v153_v18  ;;  %v152_v25 = vld [vmem:[#allocation5 + $0x380] sm:$0xff]  ;;  %v154_v27 = vld [vmem:[#allocation5 + $0x390] sm:$0xff] }
  0x3b   :  { %639 = vmatpush1.bf16.msra.mxu0 %v638_v62  ;;  %v160_v26 = vld [vmem:[#allocation5 + $0x3c0] sm:$0xff]  ;;  %v712_v28 = vpack.c.bf16 %v163_v21, %v155_v20  ;;  %v162_v29 = vld [vmem:[#allocation5 + $0x3d0] sm:$0xff]  ;;  %v169_v30 = vld [vmem:[#allocation5 + $0x408] sm:$0xff] }
  0x3c   :  { %703 = vmatpush1.bf16.msra.mxu1 %v702_v63  ;;  %641 = vmatprep.subr.bf16.mxu0 %v640_v0  ;;  %v177_v31 = vld [vmem:[#allocation5 + $0x448] sm:$0xff]  ;;  %v171_v32 = vld [vmem:[#allocation5 + $0x418] sm:$0xff]  ;;  %v650_v34 = vpack.c.bf16 %v160_v26, %v152_v25  ;;  %v714_v35 = vpack.c.bf16 %v162_v29, %v154_v27  ;;  %v168_v37 = vld [vmem:[#allocation5 + $0x400] sm:$0xff] }
  0x3d   :  { %705 = vmatprep.subr.bf16.mxu1 %v704_v4  ;;  %v179_v33 = vld [vmem:[#allocation5 + $0x458] sm:$0xff]  ;;  %v652_v36 = vpack.c.bf16 %v177_v31, %v169_v30  ;;  %v176_v38 = vld [vmem:[#allocation5 + $0x440] sm:$0xff]  ;;  %v170_v39 = vld [vmem:[#allocation5 + $0x410] sm:$0xff] }
  0x3e   :  { %v716_v40 = vpack.c.bf16 %v179_v33, %v171_v32  ;;  %v178_v41 = vld [vmem:[#allocation5 + $0x450] sm:$0xff]  ;;  %v185_v42 = vld [vmem:[#allocation5 + $0x488] sm:$0xff]  ;;  %v187_v44 = vld [vmem:[#allocation5 + $0x498] sm:$0xff]  ;;  %v654_v46 = vpack.c.bf16 %v176_v38, %v168_v37 }
  0x3f   :  { %643 = vmatpush1.bf16.msra.mxu0 %v642_v10  ;;  %v193_v43 = vld [vmem:[#allocation5 + $0x4c8] sm:$0xff]  ;;  %v195_v45 = vld [vmem:[#allocation5 + $0x4d8] sm:$0xff]  ;;  %v718_v47 = vpack.c.bf16 %v178_v41, %v170_v39  ;;  %v184_v49 = vld [vmem:[#allocation5 + $0x480] sm:$0xff] }
  0x40   :  { %707 = vmatpush1.bf16.msra.mxu1 %v706_v11  ;;  %645 = vmatprep.subr.bf16.mxu0 %v644_v12  ;;  %v656_v48 = vpack.c.bf16 %v193_v43, %v185_v42  ;;  %v192_v50 = vld [vmem:[#allocation5 + $0x4c0] sm:$0xff]  ;;  %v186_v51 = vld [vmem:[#allocation5 + $0x490] sm:$0xff]  ;;  %v720_v52 = vpack.c.bf16 %v195_v45, %v187_v44  ;;  %v201_v54 = vld [vmem:[#allocation5 + $0x508] sm:$0xff] }
  0x41   :  { %709 = vmatprep.subr.bf16.mxu1 %v708_v16  ;;  %v194_v53 = vld [vmem:[#allocation5 + $0x4d0] sm:$0xff]  ;;  %v209_v55 = vld [vmem:[#allocation5 + $0x548] sm:$0xff]  ;;  %v203_v56 = vld [vmem:[#allocation5 + $0x518] sm:$0xff]  ;;  %v658_v58 = vpack.c.bf16 %v192_v50, %v184_v49 }
  0x42   :  { %v211_v57 = vld [vmem:[#allocation5 + $0x558] sm:$0xff]  ;;  %v722_v59 = vpack.c.bf16 %v194_v53, %v186_v51  ;;  %v660_v60 = vpack.c.bf16 %v209_v55, %v201_v54  ;;  %v200_v61 = vld [vmem:[#allocation5 + $0x500] sm:$0xff]  ;;  %v202_v63 = vld [vmem:[#allocation5 + $0x510] sm:$0xff] }
  0x43   :  { %647 = vmatpush1.bf16.msra.mxu0 %v646_v22  ;;  %v208_v62 = vld [vmem:[#allocation5 + $0x540] sm:$0xff]  ;;  %v724_v0 = vpack.c.bf16 %v211_v57, %v203_v56  ;;  %v210_v1 = vld [vmem:[#allocation5 + $0x550] sm:$0xff]  ;;  %v217_v2 = vld [vmem:[#allocation5 + $0x588] sm:$0xff] }
  0x44   :  { %711 = vmatpush1.bf16.msra.mxu1 %v710_v23  ;;  %649 = vmatprep.subr.bf16.mxu0 %v648_v24  ;;  %v225_v3 = vld [vmem:[#allocation5 + $0x5c8] sm:$0xff]  ;;  %v219_v4 = vld [vmem:[#allocation5 + $0x598] sm:$0xff]  ;;  %v662_v6 = vpack.c.bf16 %v208_v62, %v200_v61  ;;  %v216_v7 = vld [vmem:[#allocation5 + $0x580] sm:$0xff]  ;;  %v726_v8 = vpack.c.bf16 %v210_v1, %v202_v63 }
  0x45   :  { %713 = vmatprep.subr.bf16.mxu1 %v712_v28  ;;  %v227_v5 = vld [vmem:[#allocation5 + $0x5d8] sm:$0xff]  ;;  %v664_v9 = vpack.c.bf16 %v225_v3, %v217_v2  ;;  %v224_v10 = vld [vmem:[#allocation5 + $0x5c0] sm:$0xff]  ;;  %v218_v11 = vld [vmem:[#allocation5 + $0x590] sm:$0xff] }
  0x46   :  { %v226_v12 = vld [vmem:[#allocation5 + $0x5d0] sm:$0xff]  ;;  %v728_v13 = vpack.c.bf16 %v227_v5, %v219_v4  ;;  %v233_v14 = vld [vmem:[#allocation5 + $0x608] sm:$0xff]  ;;  %v1004_v16 = vld [vmem:[#allocation2 + $0x8] sm:$0xff]  ;;  %v666_v19 = vpack.c.bf16 %v224_v10, %v216_v7 }
  0x47   :  { %651 = vmatpush1.bf16.msra.mxu0 %v650_v34  ;;  %v241_v15 = vld [vmem:[#allocation5 + $0x648] sm:$0xff]  ;;  %v235_v17 = vld [vmem:[#allocation5 + $0x618] sm:$0xff]  ;;  %360 = vmatprep.mubr.f32.mxu0 %v1004_v16  ;;  %v730_v20 = vpack.c.bf16 %v226_v12, %v218_v11  ;;  %v232_v22 = vld [vmem:[#allocation5 + $0x600] sm:$0xff] }
  0x48   :  { %715 = vmatpush1.bf16.msra.mxu1 %v714_v35  ;;  %653 = vmatprep.subr.bf16.mxu0 %v652_v36  ;;  %v243_v18 = vld [vmem:[#allocation5 + $0x658] sm:$0xff]  ;;  %v668_v21 = vpack.c.bf16 %v241_v15, %v233_v14  ;;  %v240_v23 = vld [vmem:[#allocation5 + $0x640] sm:$0xff]  ;;  %v234_v24 = vld [vmem:[#allocation5 + $0x610] sm:$0xff] }
  0x49   :  { %717 = vmatprep.subr.bf16.mxu1 %v716_v40  ;;  %431 = vmatprep.mubr.f32.mxu1 %v1004_v16  ;;  %v732_v25 = vpack.c.bf16 %v243_v18, %v235_v17  ;;  %v242_v26 = vld [vmem:[#allocation5 + $0x650] sm:$0xff]  ;;  %v249_v27 = vld [vmem:[#allocation5 + $0x688] sm:$0xff]  ;;  %v251_v29 = vld [vmem:[#allocation5 + $0x698] sm:$0xff]  ;;  %v670_v31 = vpack.c.bf16 %v240_v23, %v232_v22 }
  0x4a   :  { %v257_v28 = vld [vmem:[#allocation5 + $0x6c8] sm:$0xff]  ;;  %v259_v30 = vld [vmem:[#allocation5 + $0x6d8] sm:$0xff]  ;;  %v734_v32 = vpack.c.bf16 %v242_v26, %v234_v24  ;;  %v248_v34 = vld [vmem:[#allocation5 + $0x680] sm:$0xff] }
  0x4b   :  { %655 = vmatpush1.bf16.msra.mxu0 %v654_v46  ;;  %v672_v33 = vpack.c.bf16 %v257_v28, %v249_v27  ;;  %v256_v35 = vld [vmem:[#allocation5 + $0x6c0] sm:$0xff]  ;;  %v250_v36 = vld [vmem:[#allocation5 + $0x690] sm:$0xff]  ;;  %v736_v37 = vpack.c.bf16 %v259_v30, %v251_v29  ;;  %v265_v39 = vld [vmem:[#allocation5 + $0x708] sm:$0xff] }
  0x4c   :  { %719 = vmatpush1.bf16.msra.mxu1 %v718_v47  ;;  %657 = vmatprep.subr.bf16.mxu0 %v656_v48  ;;  %v258_v38 = vld [vmem:[#allocation5 + $0x6d0] sm:$0xff]  ;;  %v273_v40 = vld [vmem:[#allocation5 + $0x748] sm:$0xff]  ;;  %v267_v41 = vld [vmem:[#allocation5 + $0x718] sm:$0xff]  ;;  %v674_v43 = vpack.c.bf16 %v256_v35, %v248_v34 }
  0x4d   :  { %721 = vmatprep.subr.bf16.mxu1 %v720_v52  ;;  %v275_v42 = vld [vmem:[#allocation5 + $0x758] sm:$0xff]  ;;  %v738_v44 = vpack.c.bf16 %v258_v38, %v250_v36  ;;  %v676_v45 = vpack.c.bf16 %v273_v40, %v265_v39  ;;  %v264_v46 = vld [vmem:[#allocation5 + $0x700] sm:$0xff]  ;;  %v266_v48 = vld [vmem:[#allocation5 + $0x710] sm:$0xff] }
  0x4e   :  { %v272_v47 = vld [vmem:[#allocation5 + $0x740] sm:$0xff]  ;;  %v740_v49 = vpack.c.bf16 %v275_v42, %v267_v41  ;;  %v274_v50 = vld [vmem:[#allocation5 + $0x750] sm:$0xff]  ;;  %v281_v51 = vld [vmem:[#allocation5 + $0x788] sm:$0xff] }
  0x4f   :  { %659 = vmatpush1.bf16.msra.mxu0 %v658_v58  ;;  %v289_v52 = vld [vmem:[#allocation5 + $0x7c8] sm:$0xff]  ;;  %v283_v53 = vld [vmem:[#allocation5 + $0x798] sm:$0xff]  ;;  %v678_v55 = vpack.c.bf16 %v272_v47, %v264_v46  ;;  %v742_v56 = vpack.c.bf16 %v274_v50, %v266_v48  ;;  %v280_v58 = vld [vmem:[#allocation5 + $0x780] sm:$0xff] }
  0x50   :  { %723 = vmatpush1.bf16.msra.mxu1 %v722_v59  ;;  %661 = vmatprep.subr.bf16.mxu0 %v660_v60  ;;  %v291_v54 = vld [vmem:[#allocation5 + $0x7d8] sm:$0xff]  ;;  %v680_v57 = vpack.c.bf16 %v289_v52, %v281_v51  ;;  %v288_v59 = vld [vmem:[#allocation5 + $0x7c0] sm:$0xff]  ;;  %v282_v60 = vld [vmem:[#allocation5 + $0x790] sm:$0xff] }
  0x51   :  { %725 = vmatprep.subr.bf16.mxu1 %v724_v0  ;;  %v744_v61 = vpack.c.bf16 %v291_v54, %v283_v53  ;;  %v290_v62 = vld [vmem:[#allocation5 + $0x7d0] sm:$0xff]  ;;  %v45_v63 = vld [vmem:[#allocation5 + $0x28] sm:$0xff]  ;;  %v47_v1 = vld [vmem:[#allocation5 + $0x38] sm:$0xff]  ;;  %v682_v3 = vpack.c.bf16 %v288_v59, %v280_v58 }
  0x52   :  { %v53_v0 = vld [vmem:[#allocation5 + $0x68] sm:$0xff]  ;;  %v55_v2 = vld [vmem:[#allocation5 + $0x78] sm:$0xff]  ;;  %v746_v4 = vpack.c.bf16 %v290_v62, %v282_v60  ;;  %v52_v7 = vld [vmem:[#allocation5 + $0x60] sm:$0xff] }
  0x53   :  { %663 = vmatpush1.bf16.msra.mxu0 %v662_v6  ;;  %v748_v5 = vpack.c.bf16 %v53_v0, %v45_v63  ;;  %v44_v6 = vld [vmem:[#allocation5 + $0x20] sm:$0xff]  ;;  %v54_v10 = vld [vmem:[#allocation5 + $0x70] sm:$0xff]  ;;  %v61_v11 = vld [vmem:[#allocation5 + $0xa8] sm:$0xff] }
  0x54   :  { %727 = vmatpush1.bf16.msra.mxu1 %v726_v8  ;;  %665 = vmatprep.subr.bf16.mxu0 %v664_v9  ;;  %v46_v8 = vld [vmem:[#allocation5 + $0x30] sm:$0xff]  ;;  %v812_v9 = vpack.c.bf16 %v55_v2, %v47_v1  ;;  %v69_v12 = vld [vmem:[#allocation5 + $0xe8] sm:$0xff]  ;;  %v71_v14 = vld [vmem:[#allocation5 + $0xf8] sm:$0xff]  ;;  %v750_v17 = vpack.c.bf16 %v52_v7, %v44_v6 }
  0x55   :  { %729 = vmatprep.subr.bf16.mxu1 %v728_v13  ;;  %v63_v13 = vld [vmem:[#allocation5 + $0xb8] sm:$0xff]  ;;  %v1008_v15 = vld [vmem:[#allocation2] sm:$0xff]  ;;  %v814_v18 = vpack.c.bf16 %v54_v10, %v46_v8  ;;  %v85_v26 = vld [vmem:[#allocation5 + $0x168] sm:$0xff] }
  0x56   :  { %v62_v22 = vld [vmem:[#allocation5 + $0xb0] sm:$0xff]  ;;  %v816_v23 = vpack.c.bf16 %v71_v14, %v63_v13  ;;  %v79_v27 = vld [vmem:[#allocation5 + $0x138] sm:$0xff]  ;;  %v101_v38 = vld [vmem:[#allocation5 + $0x1e8] sm:$0xff] }
  0x57   :  { %667 = vmatpush1.bf16.msra.mxu0 %v666_v19  ;;  %v752_v19 = vpack.c.bf16 %v69_v12, %v61_v11  ;;  %v70_v24 = vld [vmem:[#allocation5 + $0xf0] sm:$0xff]  ;;  %v87_v28 = vld [vmem:[#allocation5 + $0x178] sm:$0xff]  ;;  %v117_v50 = vld [vmem:[#allocation5 + $0x268] sm:$0xff] }
  0x58   :  { %731 = vmatpush1.bf16.msra.mxu1 %v730_v20  ;;  %669 = vmatprep.subr.bf16.mxu0 %v668_v21  ;;  %v60_v20 = vld [vmem:[#allocation5 + $0xa0] sm:$0xff]  ;;  %v818_v30 = vpack.c.bf16 %v70_v24, %v62_v22  ;;  %v78_v34 = vld [vmem:[#allocation5 + $0x130] sm:$0xff]  ;;  %v820_v35 = vpack.c.bf16 %v87_v28, %v79_v27  ;;  %v95_v39 = vld [vmem:[#allocation5 + $0x1b8] sm:$0xff] }
  0x59   :  { %733 = vmatprep.subr.bf16.mxu1 %v732_v25  ;;  %v68_v21 = vld [vmem:[#allocation5 + $0xe0] sm:$0xff]  ;;  %v77_v25 = vld [vmem:[#allocation5 + $0x128] sm:$0xff]  ;;  %v86_v36 = vld [vmem:[#allocation5 + $0x170] sm:$0xff] }
  0x5a   :  { %v754_v29 = vpack.c.bf16 %v68_v21, %v60_v20  ;;  %v103_v40 = vld [vmem:[#allocation5 + $0x1f8] sm:$0xff]  ;;  %v822_v42 = vpack.c.bf16 %v86_v36, %v78_v34  ;;  %v94_v46 = vld [vmem:[#allocation5 + $0x1b0] sm:$0xff]  ;;  %v125_v60 = vld [vmem:[#allocation5 + $0x2a8] sm:$0xff] }
  0x5b   :  { %671 = vmatpush1.bf16.msra.mxu0 %v670_v31  ;;  %v756_v31 = vpack.c.bf16 %v85_v26, %v77_v25  ;;  %v824_v47 = vpack.c.bf16 %v103_v40, %v95_v39  ;;  %v102_v48 = vld [vmem:[#allocation5 + $0x1f0] sm:$0xff]  ;;  %v111_v51 = vld [vmem:[#allocation5 + $0x238] sm:$0xff]  ;;  %v141_v8 = vld [vmem:[#allocation5 + $0x328] sm:$0xff] }
  0x5c   :  { %735 = vmatpush1.bf16.msra.mxu1 %v734_v32  ;;  %673 = vmatprep.subr.bf16.mxu0 %v672_v33  ;;  %v76_v32 = vld [vmem:[#allocation5 + $0x120] sm:$0xff]  ;;  %v119_v52 = vld [vmem:[#allocation5 + $0x278] sm:$0xff]  ;;  %v118_v59 = vld [vmem:[#allocation5 + $0x270] sm:$0xff] }
  0x5d   :  { %737 = vmatprep.subr.bf16.mxu1 %v736_v37  ;;  %v84_v33 = vld [vmem:[#allocation5 + $0x160] sm:$0xff]  ;;  %v93_v37 = vld [vmem:[#allocation5 + $0x1a8] sm:$0xff]  ;;  %v828_v58 = vpack.c.bf16 %v119_v52, %v111_v51  ;;  %v127_v62 = vld [vmem:[#allocation5 + $0x2b8] sm:$0xff] }
  0x5e   :  { %v758_v41 = vpack.c.bf16 %v84_v33, %v76_v32  ;;  %v135_v63 = vld [vmem:[#allocation5 + $0x2f8] sm:$0xff]  ;;  %v134_v7 = vld [vmem:[#allocation5 + $0x2f0] sm:$0xff]  ;;  %v157_v22 = vld [vmem:[#allocation5 + $0x3a8] sm:$0xff] }
  0x5f   :  { %675 = vmatpush1.bf16.msra.mxu0 %v674_v43  ;;  %v760_v43 = vpack.c.bf16 %v101_v38, %v93_v37  ;;  %v832_v6 = vpack.c.bf16 %v135_v63, %v127_v62  ;;  %v143_v10 = vld [vmem:[#allocation5 + $0x338] sm:$0xff]  ;;  %v150_v21 = vld [vmem:[#allocation5 + $0x370] sm:$0xff]  ;;  %v173_v34 = vld [vmem:[#allocation5 + $0x428] sm:$0xff] }
  0x60   :  { %739 = vmatpush1.bf16.msra.mxu1 %v738_v44  ;;  %677 = vmatprep.subr.bf16.mxu0 %v676_v45  ;;  %v92_v44 = vld [vmem:[#allocation5 + $0x1a0] sm:$0xff]  ;;  %v151_v11 = vld [vmem:[#allocation5 + $0x378] sm:$0xff]  ;;  %v166_v33 = vld [vmem:[#allocation5 + $0x3f0] sm:$0xff] }
  0x61   :  { %741 = vmatprep.subr.bf16.mxu1 %v740_v49  ;;  %v100_v45 = vld [vmem:[#allocation5 + $0x1e0] sm:$0xff]  ;;  %v109_v49 = vld [vmem:[#allocation5 + $0x228] sm:$0xff]  ;;  %v836_v20 = vpack.c.bf16 %v151_v11, %v143_v10  ;;  %v159_v24 = vld [vmem:[#allocation5 + $0x3b8] sm:$0xff] }
  0x62   :  { %v762_v53 = vpack.c.bf16 %v100_v45, %v92_v44  ;;  %v764_v54 = vpack.c.bf16 %v117_v50, %v109_v49  ;;  %v167_v25 = vld [vmem:[#allocation5 + $0x3f8] sm:$0xff]  ;;  %v182_v45 = vld [vmem:[#allocation5 + $0x470] sm:$0xff] }
  0x63   :  { %679 = vmatpush1.bf16.msra.mxu0 %v678_v55  ;;  %v108_v55 = vld [vmem:[#allocation5 + $0x220] sm:$0xff]  ;;  %v840_v32 = vpack.c.bf16 %v167_v25, %v159_v24  ;;  %v175_v36 = vld [vmem:[#allocation5 + $0x438] sm:$0xff] }
  0x64   :  { %743 = vmatpush1.bf16.msra.mxu1 %v742_v56  ;;  %681 = vmatprep.subr.bf16.mxu0 %v680_v57  ;;  %v116_v56 = vld [vmem:[#allocation5 + $0x260] sm:$0xff]  ;;  %v110_v57 = vld [vmem:[#allocation5 + $0x230] sm:$0xff]  ;;  %v183_v37 = vld [vmem:[#allocation5 + $0x478] sm:$0xff] }
  0x65   :  { %745 = vmatprep.subr.bf16.mxu1 %v744_v61  ;;  %v133_v61 = vld [vmem:[#allocation5 + $0x2e8] sm:$0xff]  ;;  %v766_v0 = vpack.c.bf16 %v116_v56, %v108_v55  ;;  %v830_v1 = vpack.c.bf16 %v118_v59, %v110_v57  ;;  %v844_v44 = vpack.c.bf16 %v183_v37, %v175_v36  ;;  %v199_v49 = vld [vmem:[#allocation5 + $0x4f8] sm:$0xff]  ;;  %v198_v56 = vld [vmem:[#allocation5 + $0x4f0] sm:$0xff] }
  0x66   :  { %v768_v2 = vpack.c.bf16 %v133_v61, %v125_v60  ;;  %v205_v57 = vld [vmem:[#allocation5 + $0x528] sm:$0xff]  ;;  %v207_v59 = vld [vmem:[#allocation5 + $0x538] sm:$0xff] }
  0x67   :  { %683 = vmatpush1.bf16.msra.mxu0 %v682_v3  ;;  %v124_v3 = vld [vmem:[#allocation5 + $0x2a0] sm:$0xff]  ;;  %v215_v60 = vld [vmem:[#allocation5 + $0x578] sm:$0xff] }
  0x68   :  { %747 = vmatpush1.bf16.msra.mxu1 %v746_v4  ;;  %749 = vmatprep.subr.bf16.mxu0 %v748_v5  ;;  %v132_v4 = vld [vmem:[#allocation5 + $0x2e0] sm:$0xff]  ;;  %v126_v5 = vld [vmem:[#allocation5 + $0x2b0] sm:$0xff] }
  0x69   :  { %813 = vmatprep.subr.bf16.mxu1 %v812_v9  ;;  %v149_v9 = vld [vmem:[#allocation5 + $0x368] sm:$0xff]  ;;  %v770_v12 = vpack.c.bf16 %v132_v4, %v124_v3  ;;  %v834_v13 = vpack.c.bf16 %v134_v7, %v126_v5  ;;  %v852_v3 = vpack.c.bf16 %v215_v60, %v207_v59  ;;  %v214_v4 = vld [vmem:[#allocation5 + $0x570] sm:$0xff]  ;;  %v223_v7 = vld [vmem:[#allocation5 + $0x5b8] sm:$0xff] }
  0x6a   :  { %361 = vmatmul.mubr.f32.vlgmr.msra.gmra.mrb[0].mxu0 %v1008_v15  ;;  %v772_v14 = vpack.c.bf16 %v149_v9, %v141_v8  ;;  %v221_v5 = vld [vmem:[#allocation5 + $0x5a8] sm:$0xff]  ;;  %v231_v8 = vld [vmem:[#allocation5 + $0x5f8] sm:$0xff] }
  0x6b   :  { %432 = vmatmul.mubr.f32.vlgmr.msra.gmra.mrb[0].mxu1 %v1008_v15  ;;  %751 = vmatpush1.bf16.msra.mxu0 %v750_v17  ;;  %v140_v17 = vld [vmem:[#allocation5 + $0x320] sm:$0xff] }
  0x6c   :  { %815 = vmatpush1.bf16.msra.mxu1 %v814_v18  ;;  %753 = vmatprep.subr.bf16.mxu0 %v752_v19  ;;  %v148_v18 = vld [vmem:[#allocation5 + $0x360] sm:$0xff]  ;;  %v142_v19 = vld [vmem:[#allocation5 + $0x330] sm:$0xff] }
  0x6d   :  { %817 = vmatprep.subr.bf16.mxu1 %v816_v23  ;;  %502 = vmatprep.mubr.f32.mxu0 %v1004_v16  ;;  %v165_v23 = vld [vmem:[#allocation5 + $0x3e8] sm:$0xff]  ;;  %v774_v26 = vpack.c.bf16 %v148_v18, %v140_v17  ;;  %v838_v27 = vpack.c.bf16 %v150_v21, %v142_v19  ;;  %v856_v17 = vpack.c.bf16 %v231_v8, %v223_v7  ;;  %v230_v18 = vld [vmem:[#allocation5 + $0x5f0] sm:$0xff]  ;;  %v239_v21 = vld [vmem:[#allocation5 + $0x638] sm:$0xff] }
  0x6e   :  { %573 = vmatprep.mubr.f32.mxu1 %v1004_v16  ;;  %v826_v16 = vpack.c.bf16 %v102_v48, %v94_v46  ;;  %v776_v28 = vpack.c.bf16 %v165_v23, %v157_v22  ;;  %v189_v46 = vld [vmem:[#allocation5 + $0x4a8] sm:$0xff]  ;;  %v191_v48 = vld [vmem:[#allocation5 + $0x4b8] sm:$0xff] }
  0x6f   :  { %755 = vmatpush1.bf16.msra.mxu0 %v754_v29  ;;  %v156_v29 = vld [vmem:[#allocation5 + $0x3a0] sm:$0xff]  ;;  %v848_v55 = vpack.c.bf16 %v199_v49, %v191_v48  ;;  %v237_v19 = vld [vmem:[#allocation5 + $0x628] sm:$0xff]  ;;  %v247_v22 = vld [vmem:[#allocation5 + $0x678] sm:$0xff] }
  0x70   :  { %819 = vmatpush1.bf16.msra.mxu1 %v818_v30  ;;  %757 = vmatprep.subr.bf16.mxu0 %v756_v31  ;;  %v164_v30 = vld [vmem:[#allocation5 + $0x3e0] sm:$0xff]  ;;  %v158_v31 = vld [vmem:[#allocation5 + $0x3b0] sm:$0xff] }
  0x71   :  { %821 = vmatprep.subr.bf16.mxu1 %v820_v35  ;;  %v181_v35 = vld [vmem:[#allocation5 + $0x468] sm:$0xff]  ;;  %v778_v38 = vpack.c.bf16 %v164_v30, %v156_v29  ;;  %v842_v39 = vpack.c.bf16 %v166_v33, %v158_v31  ;;  %v860_v29 = vpack.c.bf16 %v247_v22, %v239_v21  ;;  %v246_v30 = vld [vmem:[#allocation5 + $0x670] sm:$0xff]  ;;  %v255_v33 = vld [vmem:[#allocation5 + $0x6b8] sm:$0xff] }
  0x72   :  { %v780_v40 = vpack.c.bf16 %v181_v35, %v173_v34  ;;  %v253_v31 = vld [vmem:[#allocation5 + $0x6a8] sm:$0xff]  ;;  %v263_v34 = vld [vmem:[#allocation5 + $0x6f8] sm:$0xff] }
  0x73   :  { %759 = vmatpush1.bf16.msra.mxu0 %v758_v41  ;;  %v172_v41 = vld [vmem:[#allocation5 + $0x420] sm:$0xff] }
  0x74   :  { %823 = vmatpush1.bf16.msra.mxu1 %v822_v42  ;;  %761 = vmatprep.subr.bf16.mxu0 %v760_v43  ;;  %v180_v42 = vld [vmem:[#allocation5 + $0x460] sm:$0xff]  ;;  %v174_v43 = vld [vmem:[#allocation5 + $0x430] sm:$0xff] }
  0x75   :  { %825 = vmatprep.subr.bf16.mxu1 %v824_v47  ;;  %v197_v47 = vld [vmem:[#allocation5 + $0x4e8] sm:$0xff]  ;;  %v782_v50 = vpack.c.bf16 %v180_v42, %v172_v41  ;;  %v846_v51 = vpack.c.bf16 %v182_v45, %v174_v43  ;;  %v864_v41 = vpack.c.bf16 %v263_v34, %v255_v33  ;;  %v262_v42 = vld [vmem:[#allocation5 + $0x6f0] sm:$0xff]  ;;  %v271_v45 = vld [vmem:[#allocation5 + $0x738] sm:$0xff] }
  0x76   :  { %v784_v52 = vpack.c.bf16 %v197_v47, %v189_v46  ;;  %v269_v43 = vld [vmem:[#allocation5 + $0x728] sm:$0xff]  ;;  %v279_v46 = vld [vmem:[#allocation5 + $0x778] sm:$0xff] }
  0x77   :  { %763 = vmatpush1.bf16.msra.mxu0 %v762_v53  ;;  %v188_v53 = vld [vmem:[#allocation5 + $0x4a0] sm:$0xff] }
  0x78   :  { %827 = vmatpush1.bf16.msra.mxu1 %v826_v16  ;;  %765 = vmatprep.subr.bf16.mxu0 %v764_v54  ;;  %v196_v16 = vld [vmem:[#allocation5 + $0x4e0] sm:$0xff]  ;;  %v190_v54 = vld [vmem:[#allocation5 + $0x4b0] sm:$0xff] }
  0x79   :  { %829 = vmatprep.subr.bf16.mxu1 %v828_v58  ;;  %v213_v58 = vld [vmem:[#allocation5 + $0x568] sm:$0xff]  ;;  %v786_v61 = vpack.c.bf16 %v196_v16, %v188_v53  ;;  %v850_v62 = vpack.c.bf16 %v198_v56, %v190_v54  ;;  %v868_v53 = vpack.c.bf16 %v279_v46, %v271_v45  ;;  %v278_v16 = vld [vmem:[#allocation5 + $0x770] sm:$0xff]  ;;  %v287_v56 = vld [vmem:[#allocation5 + $0x7b8] sm:$0xff] }
  0x7a   :  { %v788_v63 = vpack.c.bf16 %v213_v58, %v205_v57  ;;  %v285_v54 = vld [vmem:[#allocation5 + $0x7a8] sm:$0xff]  ;;  %v295_v57 = vld [vmem:[#allocation5 + $0x7f8] sm:$0xff] }
  0x7b   :  { %767 = vmatpush1.bf16.msra.mxu0 %v766_v0  ;;  %v204_v0 = vld [vmem:[#allocation5 + $0x520] sm:$0xff] }
  0x7c   :  { %831 = vmatpush1.bf16.msra.mxu1 %v830_v1  ;;  %769 = vmatprep.subr.bf16.mxu0 %v768_v2  ;;  %v212_v1 = vld [vmem:[#allocation5 + $0x560] sm:$0xff]  ;;  %v206_v2 = vld [vmem:[#allocation5 + $0x530] sm:$0xff] }
  0x7d   :  { %833 = vmatprep.subr.bf16.mxu1 %v832_v6  ;;  %v229_v6 = vld [vmem:[#allocation5 + $0x5e8] sm:$0xff]  ;;  %v790_v9 = vpack.c.bf16 %v212_v1, %v204_v0  ;;  %v854_v10 = vpack.c.bf16 %v214_v4, %v206_v2  ;;  %v286_v0 = vld [vmem:[#allocation5 + $0x7b0] sm:$0xff] }
  0x7e   :  { %v792_v11 = vpack.c.bf16 %v229_v6, %v221_v5  ;;  %v294_v1 = vld [vmem:[#allocation5 + $0x7f0] sm:$0xff] }
  0x7f   :  { %771 = vmatpush1.bf16.msra.mxu0 %v770_v12  ;;  %v220_v12 = vld [vmem:[#allocation5 + $0x5a0] sm:$0xff] }
  0x80   :  { %835 = vmatpush1.bf16.msra.mxu1 %v834_v13  ;;  %773 = vmatprep.subr.bf16.mxu0 %v772_v14  ;;  %v228_v13 = vld [vmem:[#allocation5 + $0x5e0] sm:$0xff]  ;;  %v222_v14 = vld [vmem:[#allocation5 + $0x5b0] sm:$0xff] }
  0x81   :  { %837 = vmatprep.subr.bf16.mxu1 %v836_v20  ;;  %v245_v20 = vld [vmem:[#allocation5 + $0x668] sm:$0xff]  ;;  %v794_v23 = vpack.c.bf16 %v228_v13, %v220_v12  ;;  %v858_v24 = vpack.c.bf16 %v230_v18, %v222_v14 }
  0x82   :  { %v796_v25 = vpack.c.bf16 %v245_v20, %v237_v19 }
  0x83   :  { %775 = vmatpush1.bf16.msra.mxu0 %v774_v26  ;;  %v236_v26 = vld [vmem:[#allocation5 + $0x620] sm:$0xff] }
  0x84   :  { %839 = vmatpush1.bf16.msra.mxu1 %v838_v27  ;;  %777 = vmatprep.subr.bf16.mxu0 %v776_v28  ;;  %v244_v27 = vld [vmem:[#allocation5 + $0x660] sm:$0xff]  ;;  %v238_v28 = vld [vmem:[#allocation5 + $0x630] sm:$0xff] }
  0x85   :  { %841 = vmatprep.subr.bf16.mxu1 %v840_v32  ;;  %v261_v32 = vld [vmem:[#allocation5 + $0x6e8] sm:$0xff]  ;;  %v798_v35 = vpack.c.bf16 %v244_v27, %v236_v26  ;;  %v862_v36 = vpack.c.bf16 %v246_v30, %v238_v28 }
  0x86   :  { %v800_v37 = vpack.c.bf16 %v261_v32, %v253_v31 }
  0x87   :  { %779 = vmatpush1.bf16.msra.mxu0 %v778_v38  ;;  %v252_v38 = vld [vmem:[#allocation5 + $0x6a0] sm:$0xff] }
  0x88   :  { %843 = vmatpush1.bf16.msra.mxu1 %v842_v39  ;;  %781 = vmatprep.subr.bf16.mxu0 %v780_v40  ;;  %v260_v39 = vld [vmem:[#allocation5 + $0x6e0] sm:$0xff]  ;;  %v254_v40 = vld [vmem:[#allocation5 + $0x6b0] sm:$0xff] }
  0x89   :  { %845 = vmatprep.subr.bf16.mxu1 %v844_v44  ;;  %v277_v44 = vld [vmem:[#allocation5 + $0x768] sm:$0xff]  ;;  %v802_v47 = vpack.c.bf16 %v260_v39, %v252_v38  ;;  %v866_v48 = vpack.c.bf16 %v262_v42, %v254_v40 }
  0x8a   :  { %v804_v49 = vpack.c.bf16 %v277_v44, %v269_v43 }
  0x8b   :  { %783 = vmatpush1.bf16.msra.mxu0 %v782_v50  ;;  %v268_v50 = vld [vmem:[#allocation5 + $0x720] sm:$0xff] }
  0x8c   :  { %847 = vmatpush1.bf16.msra.mxu1 %v846_v51  ;;  %785 = vmatprep.subr.bf16.mxu0 %v784_v52  ;;  %v276_v51 = vld [vmem:[#allocation5 + $0x760] sm:$0xff]  ;;  %v270_v52 = vld [vmem:[#allocation5 + $0x730] sm:$0xff] }
  0x8d   :  { %849 = vmatprep.subr.bf16.mxu1 %v848_v55  ;;  %v293_v55 = vld [vmem:[#allocation5 + $0x7e8] sm:$0xff]  ;;  %v806_v58 = vpack.c.bf16 %v276_v51, %v268_v50  ;;  %v870_v59 = vpack.c.bf16 %v278_v16, %v270_v52 }
  0x8e   :  { %v808_v60 = vpack.c.bf16 %v293_v55, %v285_v54 }
  0x8f   :  { %787 = vmatpush1.bf16.msra.mxu0 %v786_v61  ;;  %v284_v61 = vld [vmem:[#allocation5 + $0x7a0] sm:$0xff] }
  0x90   :  { %851 = vmatpush1.bf16.msra.mxu1 %v850_v62  ;;  %789 = vmatprep.subr.bf16.mxu0 %v788_v63  ;;  %v292_v62 = vld [vmem:[#allocation5 + $0x7e0] sm:$0xff]  ;;  %v872_v63 = vpack.c.bf16 %v295_v57, %v287_v56 }
  0x91   :  { %853 = vmatprep.subr.bf16.mxu1 %v852_v3  ;;  %v810_v2 = vpack.c.bf16 %v292_v62, %v284_v61  ;;  %v874_v3 = vpack.c.bf16 %v294_v1, %v286_v0 }
  0x93   :  { %791 = vmatpush1.bf16.msra.mxu0 %v790_v9 }
  0x94   :  { %855 = vmatpush1.bf16.msra.mxu1 %v854_v10  ;;  %793 = vmatprep.subr.bf16.mxu0 %v792_v11 }
  0x95   :  { %857 = vmatprep.subr.bf16.mxu1 %v856_v17 }
  0x97   :  { %795 = vmatpush1.bf16.msra.mxu0 %v794_v23 }
  0x98   :  { %859 = vmatpush1.bf16.msra.mxu1 %v858_v24  ;;  %797 = vmatprep.subr.bf16.mxu0 %v796_v25 }
  0x99   :  { %861 = vmatprep.subr.bf16.mxu1 %v860_v29 }
  0x9b   :  { %799 = vmatpush1.bf16.msra.mxu0 %v798_v35 }
  0x9c   :  { %863 = vmatpush1.bf16.msra.mxu1 %v862_v36  ;;  %801 = vmatprep.subr.bf16.mxu0 %v800_v37 }
  0x9d   :  { %865 = vmatprep.subr.bf16.mxu1 %v864_v41 }
  0x9f   :  { %803 = vmatpush1.bf16.msra.mxu0 %v802_v47 }
  0xa0   :  { %867 = vmatpush1.bf16.msra.mxu1 %v866_v48  ;;  %805 = vmatprep.subr.bf16.mxu0 %v804_v49 }
  0xa1   :  { %869 = vmatprep.subr.bf16.mxu1 %v868_v53 }
  0xa3   :  { %807 = vmatpush1.bf16.msra.mxu0 %v806_v58 }
  0xa4   :  { %871 = vmatpush1.bf16.msra.mxu1 %v870_v59  ;;  %809 = vmatprep.subr.bf16.mxu0 %v808_v60 }
  0xa5   :  { %873 = vmatprep.subr.bf16.mxu1 %v872_v63 }
  0xa7   :  { %811 = vmatpush1.bf16.msra.mxu0 %v810_v2 }
  0xa8   :  { %875 = vmatpush1.bf16.msra.mxu1 %v874_v3 }
  0xaa   :  { %503 = vmatmul.mubr.f32.vlgmr.msra.gmra.mrb[2].mxu0 %v1008_v15 }
  0xab   :  { %574 = vmatmul.mubr.f32.vlgmr.msra.gmra.mrb[2].mxu1 %v1008_v15 }
 0x13d   :  { %v362_v4 = vpop.f32.mrb[0].mxu0 }
 0x13e   :  { %v580_v5 = vmul.f32 0.01, %v362_v4  ;;  %v433_v6 = vpop.f32.mrb[0].mxu1  ;;  %v364_v7 = vpop.f32.mrb[1].mxu0 }
 0x13f   :  { %v582_v8 = vmul.f32 0.01, %v433_v6  ;;  %v581_v9 = vmul.f32 0.01, %v364_v7  ;;  %v435_v10 = vpop.f32.mrb[1].mxu1 }
 0x140   :  { %v588_v11 = vmax.f32 %v362_v4, %v580_v5  ;;  %v583_v12 = vmul.f32 0.01, %v435_v10 }
 0x141   :  { %v590_v13 = vmax.f32 %v433_v6, %v582_v8  ;;  %v589_v14 = vmax.f32 %v364_v7, %v581_v9 }
 0x142   :  { %596 = vst [vmem:[#allocation7] sm:$0xff] %v588_v11  ;;  %v591_v17 = vmax.f32 %v435_v10, %v583_v12 }
 0x143   :  { %598 = vst [vmem:[#allocation7 + $0x10] sm:$0xff] %v590_v13  ;;  %597 = vst [vmem:[#allocation7 + $0x8] sm:$0xff] %v589_v14 }
 0x144   :  { %599 = vst [vmem:[#allocation7 + $0x18] sm:$0xff] %v591_v17 }
 0x17d   :  { %v504_v18 = vpop.f32.mrb[2].mxu0 }
 0x17e   :  { %v584_v19 = vmul.f32 0.01, %v504_v18  ;;  %v575_v20 = vpop.f32.mrb[2].mxu1  ;;  %v506_v15 = vpop.f32.mrb[3].mxu0 }
 0x17f   :  { %v586_v21 = vmul.f32 0.01, %v575_v20  ;;  %v585_v22 = vmul.f32 0.01, %v506_v15  ;;  %v577_v23 = vpop.f32.mrb[3].mxu1 }
 0x180   :  { %v592_v24 = vmax.f32 %v504_v18, %v584_v19  ;;  %v587_v25 = vmul.f32 0.01, %v577_v23 }
 0x181   :  { %v594_v26 = vmax.f32 %v575_v20, %v586_v21  ;;  %v593_v27 = vmax.f32 %v506_v15, %v585_v22 }
 0x182   :  { %600 = vst [vmem:[#allocation7 + $0x20] sm:$0xff] %v592_v24  ;;  %v595_v28 = vmax.f32 %v577_v23, %v587_v25 }
 0x183   :  { %602 = vst [vmem:[#allocation7 + $0x30] sm:$0xff] %v594_v26  ;;  %601 = vst [vmem:[#allocation7 + $0x28] sm:$0xff] %v593_v27 }
 0x184   :  { %603 = vst [vmem:[#allocation7 + $0x38] sm:$0xff] %v595_v28 }
 0x185   :  { %936 = shalt.err (!%p933_p6)
}
 0x186   :  { %s937_s10 = scalar_lea.hbm %s1030_s2, 1024 }
 0x187   :  { %p938_p7 = scmp.ne.s32.totalorder %s1030_s2, %s937_s10  ;;  %p941_p8 = scmp.lt.u32.totalorder %s937_s10, %s1030_s2 }
 0x189   :  { %p943_p9 = pnand %p941_p8, %p938_p7 }
 0x18b   :  { %946 = shalt.err (!%p943_p9)
}
 0x18c   :  { %613 = dma.vmem_to_hbm [thread:$0]  %s611_s6, 1024, %s1030_s2, [#allocation4]  }
 0x18d   :  { %951 = dma.done.wait [#allocation4], 1024  }
 0x18e   :  { %952 = vsyncadd [#allocation4], 4294966272 }
 0x18f   :  { %617 = vsyncpa [#allocation3], 1 }
 0x190   :  { %618 = vsyncpa [#allocation6], 1 }
 0x191   :  { %619 = vsyncpa [#allocation4], 1 }

</bundles_post_ra>
